<compile_context>
chip_gen: v5e
topology: v5e:2x2
jax: 0.10.0
libtpu: 0.0.40
codegen_flags: <defaults>
</compile_context>

<pallas_src>
import functools

import numpy as np
import jax
import jax.numpy as jnp
from jax.experimental import pallas as pl
from jax.experimental.pallas import tpu as pltpu


def _round_up(x, m):
    return ((x + m - 1) // m) * m


# ---------------------------------------------------------------------------
# Kernel: one (batch b, frame-block t) grid step of the single-scale loss.
# ---------------------------------------------------------------------------
def _sss_kernel(ft_ref, fp_ref, basis_ref, out_ref, acc_ref, *,
                NT, T_blk, n_chunks, N_half, eps):
    """Partial spectral-loss sums for one frame-row block of one batch element.

    ft_ref/fp_ref : (T_blk, K_pad) bf16   framed true / pred audio (zero padded)
    basis_ref     : (K_pad, 2*N_half) bf16  [win*cos*norm | -win*sin*norm]
    out_ref       : (B, 3) f32 SMEM       per-batch [sum d^2, sum sm^2, sum|log|]
    acc_ref       : (3,)  f32 SMEM        running accumulators across t blocks
    """
    b = pl.program_id(0)
    t = pl.program_id(1)

    @pl.when(t == 0)
    def _():
        acc_ref[0] = jnp.float32(0.0)
        acc_ref[1] = jnp.float32(0.0)
        acc_ref[2] = jnp.float32(0.0)

    bs = basis_ref[...]
    rows_c = T_blk // n_chunks

    d2 = jnp.float32(0.0)
    sm2 = jnp.float32(0.0)
    lg = jnp.float32(0.0)
    # Statically unrolled row chunks: the MXU pushes of chunk c+1 are
    # independent of the EUP (sqrt / reciprocal / log) stream of chunk c, so
    # the scheduler can interleave MXU and EUP slots.
    for c in range(n_chunks):
        r0, r1 = c * rows_c, (c + 1) * rows_c
        sp_t = jnp.dot(ft_ref[r0:r1, :], bs, preferred_element_type=jnp.float32)
        sp_p = jnp.dot(fp_ref[r0:r1, :], bs, preferred_element_type=jnp.float32)

        re_t = sp_t[:, :N_half]
        im_t = sp_t[:, N_half:]
        re_p = sp_p[:, :N_half]
        im_p = sp_p[:, N_half:]
        # Window normalization is folded into the basis; + eps matches
        # S = Spectrogram(x) + eps.
        mt = jnp.sqrt(re_t * re_t + im_t * im_t) + eps
        mp = jnp.sqrt(re_p * re_p + im_p * im_p) + eps

        # Padded rows / frequency lanes give mt == mp == eps exactly, so
        # d == 0 and log(mt/mp) == 0 there (no masks needed); only sm picks up
        # 2*eps per padded element, corrected by a constant outside the kernel.
        d = mt - mp
        sm = mt + mp
        ratio = mt * pl.reciprocal(mp, approx=True)   # EUP, one log per element
        d2 = d2 + jnp.sum(d * d)
        sm2 = sm2 + jnp.sum(sm * sm)
        lg = lg + jnp.sum(jnp.abs(jnp.log(ratio)))

    acc_ref[0] += d2
    acc_ref[1] += sm2
    acc_ref[2] += lg

    @pl.when(t == NT - 1)
    def _():
        out_ref[b, 0] = acc_ref[0]
        out_ref[b, 1] = acc_ref[1]
        out_ref[b, 2] = acc_ref[2]


# ---------------------------------------------------------------------------
# Per-scale host wrapper around pallas_call.
# ---------------------------------------------------------------------------
def _choose_blocking(T, K_pad, two_nh):
    """Pick (T_blk, NT) so one block's VMEM footprint stays around ~8 MiB."""
    T8 = _round_up(max(T, 1), 8)
    # bf16 frames (true+pred, double buffered) + f32 spec/mag temps per row.
    bytes_per_row = 8 * K_pad + 16 * two_nh
    max_rows = max(8, min(512, ((8 << 20) // bytes_per_row) // 8 * 8))
    if T8 <= max_rows:
        return T8, 1
    T_blk = max_rows
    NT = -(-T8 // T_blk)
    return T_blk, NT


def _make_basis(n_fft, n_freq, K_pad, N_half):
    """Windowed real-DFT basis [win*cos*norm | -win*sin*norm], zero padded."""
    n = np.arange(n_fft)
    w = 0.5 - 0.5 * np.cos(2.0 * np.pi * n / n_fft)     # periodic Hann
    norm = 1.0 / np.sqrt(np.sum(w * w))                 # normalized=True
    ang = 2.0 * np.pi * np.outer(n, np.arange(n_freq)) / n_fft
    basis = np.zeros((K_pad, 2 * N_half), np.float32)
    basis[:n_fft, :n_freq] = norm * w[:, None] * np.cos(ang)
    basis[:n_fft, N_half:N_half + n_freq] = -norm * w[:, None] * np.sin(ang)
    return jnp.asarray(basis, dtype=jnp.bfloat16)


def _sss_pallas(ft, fp, basis, *, B, T, T_blk, NT, n_freq, K_pad, N_half,
                alpha, eps):
    """Single-scale spectral loss (one n_fft) via one gridded pallas_call."""
    T_pad = T_blk * NT
    two_nh = 2 * N_half
    n_chunks = 2 if (T_blk >= 128 and T_blk % 16 == 0) else 1

    kernel = functools.partial(_sss_kernel, NT=NT, T_blk=T_blk,
                               n_chunks=n_chunks, N_half=N_half, eps=float(eps))

    # Explicit VMEM budget (review: size against v7x's 64 MiB physical VMEM):
    # double-buffered frames blocks + resident basis + f32 temporaries.
    est = (2 * 2 * T_blk * K_pad * 2        # ft + fp blocks, x2 buffers, bf16
           + 2 * K_pad * two_nh * 2         # basis (buffer pair), bf16
           + 8 * T_blk * two_nh * 4         # f32 spec / mag / diff temporaries
           + (2 << 20))                     # slack
    vmem_limit = int(min(64 << 20, max(32 << 20, est)))

    out = pl.pallas_call(
        kernel,
        out_shape=jax.ShapeDtypeStruct((B, 3), jnp.float32),
        grid=(B, NT),
        in_specs=[
            pl.BlockSpec((T_blk, K_pad), lambda b, t: (b * NT + t, 0)),
            pl.BlockSpec((T_blk, K_pad), lambda b, t: (b * NT + t, 0)),
            # Constant index map -> basis DMA'd once, stays VMEM-resident.
            pl.BlockSpec((K_pad, two_nh), lambda b, t: (0, 0)),
        ],
        out_specs=pl.BlockSpec(memory_space=pltpu.MemorySpace.SMEM),
        scratch_shapes=[pltpu.SMEM((3,), jnp.float32)],
        compiler_params=pltpu.CompilerParams(
            # TODO(synk): batch axis -> "parallel" (per-b blocked output) for
            # v7x megacore; the frame-block reduction axis stays "arbitrary".
            dimension_semantics=("arbitrary", "arbitrary"),
            vmem_limit_bytes=vmem_limit),
    )(ft, fp, basis)

    # Finalize on a tiny (B,) vector: remove the (2*eps)^2 contribution of the
    # zero-padded rows/lanes from sum(sm^2), then sqrt * rsqrt and divides.
    pad_corr = (T_pad * N_half - T * n_freq) * (2.0 * eps) ** 2
    d2 = out[:, 0]
    sm2 = out[:, 1] - pad_corr
    lg = out[:, 2]
    conv = jnp.mean(jnp.sqrt(d2) * jax.lax.rsqrt(sm2))
    log_term = jnp.sum(lg) / (B * T * n_freq)
    return conv + alpha * log_term


# ---------------------------------------------------------------------------
# Multi-scale pipeline, specialized per static FFT-size tuple and cached.
# ---------------------------------------------------------------------------
@functools.lru_cache(maxsize=128)
def _build_rss_fn(n_ffts, B, L, alpha, overlap, eps):
    metas, bases = [], []
    for n_fft in n_ffts:
        n_fft = int(n_fft)
        hop = int(n_fft * (1 - overlap))
        assert hop == n_fft, "RSSLoss default overlap=0 -> hop == n_fft"
        assert n_fft <= L, "audio shorter than n_fft"
        T = 1 + (L - n_fft) // hop            # center=False
        n_freq = n_fft // 2 + 1
        K_pad = _round_up(n_fft, 128)
        N_half = _round_up(n_freq, 128)
        T_blk, NT = _choose_blocking(T, K_pad, 2 * N_half)
        metas.append((n_fft, T, T_blk, NT, n_freq, K_pad, N_half))
        bases.append(_make_basis(n_fft, n_freq, K_pad, N_half))

    def fn(x_pred, x_true, *bases_dev):
        total = jnp.float32(0.0)
        for (n_fft, T, T_blk, NT, n_freq, K_pad, N_half), basis in zip(
                metas, bases_dev):
            T_pad = T_blk * NT

            def frame(x, n_fft=n_fft, T=T, T_pad=T_pad, K_pad=K_pad):
                # hop == n_fft -> frames are a contiguous reshape; cast to bf16
                # *before* pad/reshape so no f32 intermediates hit HBM.
                f = x[:, :T * n_fft].astype(jnp.bfloat16).reshape(B, T, n_fft)
                f = jnp.pad(f, ((0, 0), (0, T_pad - T), (0, K_pad - n_fft)))
                return f.reshape(B * T_pad, K_pad)

            total = total + _sss_pallas(
                frame(x_true), frame(x_pred), basis,
                B=B, T=T, T_blk=T_blk, NT=NT, n_freq=n_freq, K_pad=K_pad,
                N_half=N_half, alpha=alpha, eps=eps)
        return total / len(metas)

    return jax.jit(fn), tuple(bases)


def rss_loss_pallas(x_pred, x_true, n_ffts, alpha=1.0, overlap=0.0, eps=1e-7):
    """Random-scale spectral loss for a given list of (static) FFT sizes."""
    B, L = x_true.shape
    fn, bases = _build_rss_fn(tuple(int(v) for v in n_ffts), int(B), int(L),
                              float(alpha), float(overlap), float(eps))
    return fn(x_pred, x_true, *bases)


def rss_loss(x_pred, x_true, key, fft_min=64, fft_max=128, n_scale=2,
             alpha=1.0, overlap=0.0, eps=1e-7):
    """Matches RSSLoss.forward(x_pred, x_true) (random FFT sizes per call)."""
    draws = jax.random.randint(key, (n_scale,), fft_min, fft_max)
    # TODO(synk): host sync on the FFT-size draw (static shapes per n_fft).
    n_ffts = [int(v) for v in np.asarray(draws)]
    return rss_loss_pallas(x_pred, x_true, n_ffts,
                           alpha=alpha, overlap=overlap, eps=eps)


# ---------------------------------------------------------------------------
# Pure-JAX f32 reference (torchaudio Spectrogram semantics, center=False).
# ---------------------------------------------------------------------------
def _reference_rss(x_pred, x_true, n_ffts, alpha=1.0, eps=1e-7):
    B, L = x_true.shape
    total = 0.0
    for n_fft in n_ffts:
        n_fft = int(n_fft)
        T = 1 + (L - n_fft) // n_fft
        n = np.arange(n_fft)
        w = jnp.asarray(0.5 - 0.5 * np.cos(2.0 * np.pi * n / n_fft), jnp.float32)
        norm = 1.0 / jnp.sqrt(jnp.sum(w * w))

        def spec(x):
            frames = x[:, :T * n_fft].reshape(B, T, n_fft).astype(jnp.float32)
            F = jnp.fft.rfft(frames * w, axis=-1)
            return jnp.abs(F) * norm + eps

        St, Sp = spec(x_true), spec(x_pred)
        conv = jnp.mean(jnp.sqrt(jnp.sum((St - Sp) ** 2, axis=(1, 2))) /
                        jnp.sqrt(jnp.sum((St + Sp) ** 2, axis=(1, 2))))
        log_term = jnp.mean(jnp.abs(jnp.log(St) - jnp.log(Sp)))
        total = total + conv + alpha * log_term
    return total / len(n_ffts)


if __name__ == "__main__":
    key = jax.random.PRNGKey(0)
    k_pred, k_true, k_fft = jax.random.split(key, 3)

    # Check 1: small config — batch=2 waveforms of length 512, FFT sizes drawn
    # from [64, 128), n_scale=2 (same as the module's forward, scaled down).
    B, L = 2, 512
    x_pred = jax.random.normal(k_pred, (B, L), dtype=jnp.float32)
    x_true = jax.random.normal(k_true, (B, L), dtype=jnp.float32)

    loss = rss_loss(x_pred, x_true, k_fft, fft_min=64, fft_max=128, n_scale=2)
    loss = jax.block_until_ready(loss)
    assert loss.shape == () and bool(jnp.isfinite(loss))

    n_ffts = [int(v) for v in np.asarray(
        jax.random.randint(k_fft, (2,), 64, 128))]
    ref = float(jax.block_until_ready(_reference_rss(x_pred, x_true, n_ffts)))
    # bf16 matmul inputs (f32 accumulation) + approx reciprocal in the log
    # ratio give a small, documented precision delta vs the f32 reference.
    assert abs(float(loss) - ref) <= 0.05 * abs(ref) + 1e-2, (float(loss), ref)

    # Check 2: longer audio so the frame-block grid (NT > 1) and the pipelined
    # SMEM accumulation path are exercised.
    B2, L2 = 2, 48000
    xp2 = jax.random.normal(jax.random.PRNGKey(1), (B2, L2), jnp.float32)
    xt2 = jax.random.normal(jax.random.PRNGKey(2), (B2, L2), jnp.float32)
    n_ffts2 = [64, 100]
    loss2 = jax.block_until_ready(rss_loss_pallas(xp2, xt2, n_ffts2))
    ref2 = float(jax.block_until_ready(_reference_rss(xp2, xt2, n_ffts2)))
    assert abs(float(loss2) - ref2) <= 0.05 * abs(ref2) + 1e-2, (float(loss2), ref2)

    print("KERNEL_OK")
</pallas_src>

<mosaic_0001>
module attributes {stable_mosaic.version = 11 : i64} {
  func.func @_sss_kernel(%arg0: i32, %arg1: i32, %arg2: memref<8x128xbf16, #tpu.memory_space<vmem>>, %arg3: memref<8x128xbf16, #tpu.memory_space<vmem>>, %arg4: memref<128x256xbf16, #tpu.memory_space<vmem>>, %arg5: memref<2x3xf32, #tpu.memory_space<smem>>, %arg6: memref<3xf32, #tpu.memory_space<smem>>) attributes {dimension_semantics = [#tpu.dimension_semantics<arbitrary>, #tpu.dimension_semantics<arbitrary>], iteration_bounds = array<i64: 2, 1>, scalar_prefetch = 0 : i64, scratch_operands = 1 : i64, tpu.core_type = #tpu.core_type<tc>, window_params = [{transform_indices = @transform_0, window_bounds = array<i64: 8, 128>}, {transform_indices = @transform_1, window_bounds = array<i64: 8, 128>}, {pipeline_mode = #tpu.pipeline_mode<synchronous>, transform_indices = @transform_2, window_bounds = array<i64: 128, 256>}, {transform_indices = @transform_3, window_bounds = array<i64: 2, 3>}]} {
    %c0_i32 = arith.constant 0 : i32
    %0 = arith.cmpi eq, %arg1, %c0_i32 : i32
    %1 = arith.extui %0 : i1 to i32
    %c0_i32_0 = arith.constant 0 : i32
    %2 = arith.cmpi ne, %1, %c0_i32_0 : i32
    scf.if %2 {
      %cst_21 = arith.constant 0.000000e+00 : f32
      %c0_22 = arith.constant 0 : index
      %59 = memref.load %arg6[%c0_22] : memref<3xf32, #tpu.memory_space<smem>>
      memref.store %cst_21, %arg6[%c0_22] : memref<3xf32, #tpu.memory_space<smem>>
      %cst_23 = arith.constant 0.000000e+00 : f32
      %c1_24 = arith.constant 1 : index
      %60 = memref.load %arg6[%c1_24] : memref<3xf32, #tpu.memory_space<smem>>
      memref.store %cst_23, %arg6[%c1_24] : memref<3xf32, #tpu.memory_space<smem>>
      %cst_25 = arith.constant 0.000000e+00 : f32
      %c2_26 = arith.constant 2 : index
      %61 = memref.load %arg6[%c2_26] : memref<3xf32, #tpu.memory_space<smem>>
      memref.store %cst_25, %arg6[%c2_26] : memref<3xf32, #tpu.memory_space<smem>>
    } else {
    }
    %c0 = arith.constant 0 : index
    %c0_1 = arith.constant 0 : index
    %3 = vector.load %arg4[%c0, %c0_1] : memref<128x256xbf16, #tpu.memory_space<vmem>>, vector<128x256xbf16>
    %c0_2 = arith.constant 0 : index
    %c0_3 = arith.constant 0 : index
    %4 = vector.load %arg2[%c0_2, %c0_3] : memref<8x128xbf16, #tpu.memory_space<vmem>>, vector<8x128xbf16>
    %cst = arith.constant dense<0.000000e+00> : vector<8x256xf32>
    %5 = tpu.matmul %4, %3, %cst {dimension_numbers = #tpu.dot_dimension_numbers<[1], [0], [0], [1], [0, 0, 1, 1], [], []>} : vector<8x128xbf16>, vector<128x256xbf16>, vector<8x256xf32> -> vector<8x256xf32>
    %c0_4 = arith.constant 0 : index
    %c0_5 = arith.constant 0 : index
    %6 = vector.load %arg3[%c0_4, %c0_5] : memref<8x128xbf16, #tpu.memory_space<vmem>>, vector<8x128xbf16>
    %cst_6 = arith.constant dense<0.000000e+00> : vector<8x256xf32>
    %7 = tpu.matmul %6, %3, %cst_6 {dimension_numbers = #tpu.dot_dimension_numbers<[1], [0], [0], [1], [0, 0, 1, 1], [], []>} : vector<8x128xbf16>, vector<128x256xbf16>, vector<8x256xf32> -> vector<8x256xf32>
    %8 = vector.extract_strided_slice %5 {offsets = [0, 0], sizes = [8, 128], strides = [1, 1]} : vector<8x256xf32> to vector<8x128xf32>
    %9 = vector.extract_strided_slice %5 {offsets = [0, 128], sizes = [8, 128], strides = [1, 1]} : vector<8x256xf32> to vector<8x128xf32>
    %10 = vector.extract_strided_slice %7 {offsets = [0, 0], sizes = [8, 128], strides = [1, 1]} : vector<8x256xf32> to vector<8x128xf32>
    %11 = vector.extract_strided_slice %7 {offsets = [0, 128], sizes = [8, 128], strides = [1, 1]} : vector<8x256xf32> to vector<8x128xf32>
    %12 = arith.mulf %8, %8 : vector<8x128xf32>
    %13 = arith.mulf %9, %9 : vector<8x128xf32>
    %14 = arith.addf %12, %13 : vector<8x128xf32>
    %15 = math.sqrt %14 : vector<8x128xf32>
    %cst_7 = arith.constant 1.000000e-07 : f32
    %16 = vector.broadcast %cst_7 : f32 to vector<8x128xf32>
    %17 = arith.addf %15, %16 : vector<8x128xf32>
    %18 = arith.mulf %10, %10 : vector<8x128xf32>
    %19 = arith.mulf %11, %11 : vector<8x128xf32>
    %20 = arith.addf %18, %19 : vector<8x128xf32>
    %21 = math.sqrt %20 : vector<8x128xf32>
    %cst_8 = arith.constant 1.000000e-07 : f32
    %22 = vector.broadcast %cst_8 : f32 to vector<8x128xf32>
    %23 = arith.addf %21, %22 : vector<8x128xf32>
    %24 = arith.subf %17, %23 : vector<8x128xf32>
    %25 = arith.addf %17, %23 : vector<8x128xf32>
    %26 = tpu.reciprocal %23 {approx = true} : vector<8x128xf32> -> vector<8x128xf32>
    %27 = arith.mulf %17, %26 : vector<8x128xf32>
    %28 = arith.mulf %24, %24 : vector<8x128xf32>
    %29 = vector.shape_cast %28 : vector<8x128xf32> to vector<1x8x128xf32>
    %cst_9 = arith.constant dense<0.000000e+00> : vector<1xf32>
    %30 = vector.multi_reduction <add>, %29, %cst_9 [1, 2] : vector<1x8x128xf32> to vector<1xf32>
    %31 = vector.shape_cast %30 : vector<1xf32> to vector<1x1x1xf32>
    %32 = vector.extract %31[0, 0, 0] : f32 from vector<1x1x1xf32>
    %cst_10 = arith.constant 0.000000e+00 : f32
    %33 = arith.addf %cst_10, %32 : f32
    %34 = arith.mulf %25, %25 : vector<8x128xf32>
    %35 = vector.shape_cast %34 : vector<8x128xf32> to vector<1x8x128xf32>
    %cst_11 = arith.constant dense<0.000000e+00> : vector<1xf32>
    %36 = vector.multi_reduction <add>, %35, %cst_11 [1, 2] : vector<1x8x128xf32> to vector<1xf32>
    %37 = vector.shape_cast %36 : vector<1xf32> to vector<1x1x1xf32>
    %38 = vector.extract %37[0, 0, 0] : f32 from vector<1x1x1xf32>
    %cst_12 = arith.constant 0.000000e+00 : f32
    %39 = arith.addf %cst_12, %38 : f32
    %40 = math.log %27 : vector<8x128xf32>
    %41 = math.absf %40 : vector<8x128xf32>
    %42 = vector.shape_cast %41 : vector<8x128xf32> to vector<1x8x128xf32>
    %cst_13 = arith.constant dense<0.000000e+00> : vector<1xf32>
    %43 = vector.multi_reduction <add>, %42, %cst_13 [1, 2] : vector<1x8x128xf32> to vector<1xf32>
    %44 = vector.shape_cast %43 : vector<1xf32> to vector<1x1x1xf32>
    %45 = vector.extract %44[0, 0, 0] : f32 from vector<1x1x1xf32>
    %cst_14 = arith.constant 0.000000e+00 : f32
    %46 = arith.addf %cst_14, %45 : f32
    %c0_15 = arith.constant 0 : index
    %47 = memref.load %arg6[%c0_15] : memref<3xf32, #tpu.memory_space<smem>>
    %48 = arith.addf %47, %33 : f32
    %c0_16 = arith.constant 0 : index
    %49 = memref.load %arg6[%c0_16] : memref<3xf32, #tpu.memory_space<smem>>
    memref.store %48, %arg6[%c0_16] : memref<3xf32, #tpu.memory_space<smem>>
    %c1 = arith.constant 1 : index
    %50 = memref.load %arg6[%c1] : memref<3xf32, #tpu.memory_space<smem>>
    %51 = arith.addf %50, %39 : f32
    %c1_17 = arith.constant 1 : index
    %52 = memref.load %arg6[%c1_17] : memref<3xf32, #tpu.memory_space<smem>>
    memref.store %51, %arg6[%c1_17] : memref<3xf32, #tpu.memory_space<smem>>
    %c2 = arith.constant 2 : index
    %53 = memref.load %arg6[%c2] : memref<3xf32, #tpu.memory_space<smem>>
    %54 = arith.addf %53, %46 : f32
    %c2_18 = arith.constant 2 : index
    %55 = memref.load %arg6[%c2_18] : memref<3xf32, #tpu.memory_space<smem>>
    memref.store %54, %arg6[%c2_18] : memref<3xf32, #tpu.memory_space<smem>>
    %c0_i32_19 = arith.constant 0 : i32
    %56 = arith.cmpi eq, %arg1, %c0_i32_19 : i32
    %57 = arith.extui %56 : i1 to i32
    %c0_i32_20 = arith.constant 0 : i32
    %58 = arith.cmpi ne, %57, %c0_i32_20 : i32
    scf.if %58 {
      %c0_21 = arith.constant 0 : index
      %59 = memref.load %arg6[%c0_21] : memref<3xf32, #tpu.memory_space<smem>>
      %60 = arith.index_cast %arg0 : i32 to index
      %c0_22 = arith.constant 0 : index
      %61 = memref.load %arg5[%60, %c0_22] : memref<2x3xf32, #tpu.memory_space<smem>>
      memref.store %59, %arg5[%60, %c0_22] : memref<2x3xf32, #tpu.memory_space<smem>>
      %c1_23 = arith.constant 1 : index
      %62 = memref.load %arg6[%c1_23] : memref<3xf32, #tpu.memory_space<smem>>
      %63 = arith.index_cast %arg0 : i32 to index
      %c1_24 = arith.constant 1 : index
      %64 = memref.load %arg5[%63, %c1_24] : memref<2x3xf32, #tpu.memory_space<smem>>
      memref.store %62, %arg5[%63, %c1_24] : memref<2x3xf32, #tpu.memory_space<smem>>
      %c2_25 = arith.constant 2 : index
      %65 = memref.load %arg6[%c2_25] : memref<3xf32, #tpu.memory_space<smem>>
      %66 = arith.index_cast %arg0 : i32 to index
      %c2_26 = arith.constant 2 : index
      %67 = memref.load %arg5[%66, %c2_26] : memref<2x3xf32, #tpu.memory_space<smem>>
      memref.store %65, %arg5[%66, %c2_26] : memref<2x3xf32, #tpu.memory_space<smem>>
    } else {
    }
    return
  }
  func.func @transform_0(%arg0: i32, %arg1: i32) -> (i32, i32) {
    %c1_i32 = arith.constant 1 : i32
    %0 = arith.muli %arg0, %c1_i32 : i32
    %1 = arith.addi %0, %arg1 : i32
    %c0_i32 = arith.constant 0 : i32
    %c0_i32_0 = arith.constant 0 : i32
    return %1, %c0_i32 : i32, i32
  }
  func.func @transform_1(%arg0: i32, %arg1: i32) -> (i32, i32) {
    %c1_i32 = arith.constant 1 : i32
    %0 = arith.muli %arg0, %c1_i32 : i32
    %1 = arith.addi %0, %arg1 : i32
    %c0_i32 = arith.constant 0 : i32
    %c0_i32_0 = arith.constant 0 : i32
    return %1, %c0_i32 : i32, i32
  }
  func.func @transform_2(%arg0: i32, %arg1: i32) -> (i32, i32) {
    %c0_i32 = arith.constant 0 : i32
    %c0_i32_0 = arith.constant 0 : i32
    %c0_i32_1 = arith.constant 0 : i32
    return %c0_i32, %c0_i32_0 : i32, i32
  }
  func.func @transform_3(%arg0: i32, %arg1: i32) -> (i32, i32) {
    %c0_i32 = arith.constant 0 : i32
    %c0_i32_0 = arith.constant 0 : i32
    %c0_i32_1 = arith.constant 0 : i32
    return %c0_i32, %c0_i32_0 : i32, i32
  }
}

</mosaic_0001>

<bundles_post_ra>
// kernel: fn.3
= control target key start
LH: loop header
LB: loop body
LE: loop exit
PB: predicated region body
PF: predicated region fallthrough
CT: control target
= control target key end

     0   :  { %8 = vsyncpa [#allocation4], 0  ;;  %s866_s0 = inlined_call_operand.vmem [shape: bf16[16,128], index: 0, kind: input, shape index: {}]   ;;  %s867_s1 = inlined_call_operand.vmem [shape: bf16[16,128], index: 1, kind: input, shape index: {}]   ;;  %s868_s2 = inlined_call_operand.hbm [shape: bf16[128,256], index: 2, kind: input, shape index: {}]   ;;  %s869_s3 = inlined_call_operand.vmem [shape: f32[2,3], index: 3, kind: output, shape index: {}]  }
   0x1   :  { %9 = vsyncpa [#allocation5], 0  ;;  %s817_s12 = smov 0   ;;  %s819_s13 = smov 0  }
   0x2   :  { %s821_s14 = smov 0  }
   0x3 LB: > { %s560_s15 = sadd.s32 4294967295, %s791_s14   ;;  %s27_s16 = sadd.s32 1, %s787_s13  ;;  %s791_s14 = sphi %s821_s14, %s15_s14   ;;  %s787_s13 = sphi %s819_s13, %s871_s13   ;;  %s783_s12 = sphi %s817_s12, %s870_s12  }
   0x4   : > { %p29_p0 = scmp.ge.s32.totalorder %s27_s16, 2  ;;  %p561_p1 = scmp.ge.s32.totalorder %s791_s14, 1 }
   0x5   : > { %p130_p2 = scmp.lt.s32.totalorder %s791_s14, 3  ;;  %p677_p4 = scmp.eq.s32.totalorder %s560_s15, 0 }
   0x6   : > { %s873_s16 = smov (%p29_p0, %s27_s16), 0  ;;  %s141_s19 = sshll.u32 %s868_s2, 4  ;;  %s142_s19 = int_to_ptr.hbm [resolvable:$true] %s141_s19 }
   0x7   : > { %p131_p3 = pnand %p561_p1, %p130_p2  ;;  %s793_s20 = smov [#allocation3]  }
   0x8   : > { %s143_s21 = sshll.u32 %s793_s20, 4  ;;  %s794_s22 = smov 128   ;;  %s144_s21 = int_to_ptr.vmem [resolvable:$true] %s143_s21 }
   0x9   : > { %p673_p5 = pneg %p131_p3  ;;  %s795_s23 = smov 8  }
   0xa   : > { %177 = sbr.rel (%p131_p3) target bundleno = 413 (0x19d), region = 32 }
   0xb   : > { %p674_p6 = pnand %p677_p4, %p673_p5 }
   0xd   : > { %676 = dma.hbm_to_vmem [thread:$0]  (!%p674_p6), %s142_s19, 2048, %s144_s21, [#allocation4], %s794_s22, %s794_s22, %s795_s23  }
   0xf   : > { %774 = dma.done.wait (%p677_p4), [#allocation4], 2048  }
  0x10   : > { %776 = vsyncadd (%p677_p4), [#allocation4], 4294965248  ;;  %v626_v0 = vld [vmem:[#allocation3 + $0x70] sm:$0xf]  ;;  %v658_v1 = vld [vmem:[#allocation3 + $0x74] sm:$0xf0] }
  0x11   : > { %v657_v2 = vld [vmem:[#allocation3 + $0x74] sm:$0xf]  ;;  %v627_v3 = vor.u32 %v658_v1, %v626_v0  ;;  %v628_v4 = vld [vmem:[#allocation3 + $0x78] sm:$0xf0]  ;;  %v618_v5 = vld [vmem:[#allocation3 + $0x60] sm:$0xf] }
  0x12   : > { %v656_v6 = vld [vmem:[#allocation3 + $0x64] sm:$0xf0]  ;;  %v631_v7 = vor.u32 %v657_v2, %v628_v4  ;;  %v655_v8 = vld [vmem:[#allocation3 + $0x64] sm:$0xf]  ;;  %v620_v9 = vld [vmem:[#allocation3 + $0x68] sm:$0xf0] }
  0x13   : > { %321 = vmatpush.bf16.msra.mxu0 %v627_v3  ;;  %348 = vmatpush.bf16.msra.mxu2 %v627_v3  ;;  %v619_v10 = vor.u32 %v656_v6, %v618_v5  ;;  %v623_v11 = vor.u32 %v655_v8, %v620_v9  ;;  %v610_v12 = vld [vmem:[#allocation3 + $0x50] sm:$0xf]  ;;  %v654_v13 = vld [vmem:[#allocation3 + $0x54] sm:$0xf0]  ;;  %v653_v14 = vld [vmem:[#allocation3 + $0x54] sm:$0xf] }
  0x14   : > { %334 = vmatpush.bf16.msra.mxu1 %v631_v7  ;;  %361 = vmatpush.bf16.msra.mxu3 %v631_v7  ;;  %v612_v15 = vld [vmem:[#allocation3 + $0x58] sm:$0xf0]  ;;  %v611_v16 = vor.u32 %v654_v13, %v610_v12  ;;  %v602_v18 = vld [vmem:[#allocation3 + $0x40] sm:$0xf]  ;;  %v652_v19 = vld [vmem:[#allocation3 + $0x44] sm:$0xf0] }
  0x15   : > { %v615_v17 = vor.u32 %v653_v14, %v612_v15  ;;  %v651_v20 = vld [vmem:[#allocation3 + $0x44] sm:$0xf]  ;;  %v604_v21 = vld [vmem:[#allocation3 + $0x48] sm:$0xf0]  ;;  %v603_v22 = vor.u32 %v652_v19, %v602_v18  ;;  %v594_v24 = vld [vmem:[#allocation3 + $0x30] sm:$0xf] }
  0x16   : > { %v607_v23 = vor.u32 %v651_v20, %v604_v21  ;;  %v650_v25 = vld [vmem:[#allocation3 + $0x34] sm:$0xf0]  ;;  %v649_v26 = vld [vmem:[#allocation3 + $0x34] sm:$0xf]  ;;  %v596_v27 = vld [vmem:[#allocation3 + $0x38] sm:$0xf0] }
  0x17   : > { %322 = vmatpush.bf16.msra.mxu0 %v619_v10  ;;  %349 = vmatpush.bf16.msra.mxu2 %v619_v10  ;;  %v595_v28 = vor.u32 %v650_v25, %v594_v24  ;;  %v599_v29 = vor.u32 %v649_v26, %v596_v27  ;;  %v586_v30 = vld [vmem:[#allocation3 + $0x20] sm:$0xf]  ;;  %v648_v31 = vld [vmem:[#allocation3 + $0x24] sm:$0xf0]  ;;  %v647_v32 = vld [vmem:[#allocation3 + $0x24] sm:$0xf] }
  0x18   : > { %335 = vmatpush.bf16.msra.mxu1 %v623_v11  ;;  %362 = vmatpush.bf16.msra.mxu3 %v623_v11  ;;  %v588_v33 = vld [vmem:[#allocation3 + $0x28] sm:$0xf0]  ;;  %p203_p7 = scmp.lt.s32.totalorder %s783_s12, 1  ;;  %v587_v34 = vor.u32 %v648_v31, %v586_v30  ;;  %v578_v36 = vld [vmem:[#allocation3 + $0x10] sm:$0xf]  ;;  %s634_s5 = sshll.u32 %s783_s12, 7 }
  0x19   : > { %v591_v35 = vor.u32 %v647_v32, %v588_v33  ;;  %v646_v37 = vld [vmem:[#allocation3 + $0x14] sm:$0xf0]  ;;  %v645_v38 = vld [vmem:[#allocation3 + $0x14] sm:$0xf]  ;;  %v580_v39 = vld [vmem:[#allocation3 + $0x18] sm:$0xf0] }
  0x1a   : > { %s204_s24 = scalar_select %p203_p7, %s783_s12, 1  ;;  %v579_v40 = vor.u32 %v646_v37, %v578_v36  ;;  %v583_v41 = vor.u32 %v645_v38, %v580_v39  ;;  %v570_v42 = vld [vmem:[#allocation3] sm:$0xf]  ;;  %v644_v43 = vld [vmem:[#allocation3 + $0x4] sm:$0xf0] }
  0x1b   : > { %323 = vmatpush.bf16.msra.mxu0 %v611_v16  ;;  %350 = vmatpush.bf16.msra.mxu2 %v611_v16  ;;  %v643_v44 = vld [vmem:[#allocation3 + $0x4] sm:$0xf]  ;;  %v572_v45 = vld [vmem:[#allocation3 + $0x8] sm:$0xf0]  ;;  %v571_v46 = vor.u32 %v644_v43, %v570_v42  ;;  %s462_s7 = scalar_lea.smem [#allocation6], %s634_s5  ;;  %s478_s17 = sshll.u32 %s869_s3, 4  ;;  %s479_s17 = int_to_ptr.vmem [resolvable:$true] %s478_s17 }
  0x1c   : > { %336 = vmatpush.bf16.msra.mxu1 %v615_v17  ;;  %363 = vmatpush.bf16.msra.mxu3 %v615_v17  ;;  %s566_s25 = sshll.u32 %s204_s24, 2  ;;  %v575_v47 = vor.u32 %v643_v44, %v572_v45  ;;  %s515_s8 = scalar_lea.smem %s462_s7, 1 [#allocation6] }
  0x1d   : > { %s206_s28 = scalar_lea.vmem %s866_s0, %s566_s25  ;;  %s212_s4 = scalar_lea.vmem %s867_s1, %s566_s25 }
  0x1e   : > { %v240_v48 = vld [vmem:[%s206_s28] sm:$0xf]  ;;  %s518_s18 = scalar_lea.smem %s462_s7, 2 [#allocation6]  ;;  %p679_p8 = scmp.eq.s32.totalorder %s560_s15, 1 }
  0x1f   : > { %324 = vmatpush.bf16.msra.mxu0 %v603_v22  ;;  %351 = vmatpush.bf16.msra.mxu2 %v603_v22  ;;  %v347_v49 = vld [vmem:[%s212_s4] sm:$0xf]  ;;  %s796_s20 = smov [#allocation6]  }
  0x20   : > { %337 = vmatpush.bf16.msra.mxu1 %v607_v23  ;;  %364 = vmatpush.bf16.msra.mxu3 %v607_v23 }
  0x23   : > { %325 = vmatpush.bf16.msra.mxu0 %v595_v28  ;;  %352 = vmatpush.bf16.msra.mxu2 %v595_v28 }
  0x24   : > { %338 = vmatpush.bf16.msra.mxu1 %v599_v29  ;;  %365 = vmatpush.bf16.msra.mxu3 %v599_v29 }
  0x27   : > { %326 = vmatpush.bf16.msra.mxu0 %v587_v34  ;;  %353 = vmatpush.bf16.msra.mxu2 %v587_v34 }
  0x28   : > { %339 = vmatpush.bf16.msra.mxu1 %v591_v35  ;;  %366 = vmatpush.bf16.msra.mxu3 %v591_v35 }
  0x2b   : > { %327 = vmatpush.bf16.msra.mxu0 %v579_v40  ;;  %354 = vmatpush.bf16.msra.mxu2 %v579_v40 }
  0x2c   : > { %340 = vmatpush.bf16.msra.mxu1 %v583_v41  ;;  %367 = vmatpush.bf16.msra.mxu3 %v583_v41 }
  0x2f   : > { %328 = vmatpush.bf16.msra.mxu0 %v571_v46  ;;  %355 = vmatpush.bf16.msra.mxu2 %v571_v46 }
  0x30   : > { %341 = vmatpush.bf16.msra.mxu1 %v575_v47  ;;  %368 = vmatpush.bf16.msra.mxu3 %v575_v47 }
  0x32   : > { %329 = vmatmul.bf16.vlgmr.msra.gmra.mxu0 %v240_v48  ;;  %356 = vmatmul.bf16.vlgmr.msra.gmra.mxu2 %v347_v49 }
  0x33   : > { %342 = vmatmul.bf16.vlgmr.msra.gmra.mxu1 %v240_v48  ;;  %369 = vmatmul.bf16.vlgmr.msra.gmra.mxu3 %v347_v49 }
  0xaf   : > { %v330_v50 = vpop.f32.mrf.mxu0 }
  0xb0   : > { %v374_v51 = vmul.f32 %v330_v50, %v330_v50  ;;  %v343_v52 = vpop.f32.mrf.mxu1 }
  0xb1   : > { %v375_v53 = vmul.f32 %v343_v52, %v343_v52 }
  0xb3   : > { %v376_v54 = vadd.f32 %v375_v53, %v374_v51 }
  0xb5   : > { %709 = vrsqrt.f32 %v376_v54  ;;  %v357_v55 = vpop.f32.mrf.mxu2  ;;  %vm384_vm0 = vcmp.eq.f32.partialorder %v376_v54, inf  ;;  %v387_v14 = vand.u32 2147483648, %v376_v54  ;;  %vm386_vm1 = vcmp.eq.f32.partialorder %v376_v54, 0.0 }
  0xb6   : > { %v390_v56 = vmul.f32 %v357_v55, %v357_v55  ;;  %v370_v57 = vpop.f32.mrf.mxu3 }
  0xb7   : > { %v391_v58 = vmul.f32 %v370_v57, %v370_v57  ;;  %v332_v59 = vpop.f32.mrf.mxu0 }
  0xb8   : > { %v345_v60 = vpop.f32.mrf.mxu1 }
  0xb9   : > { %v392_v61 = vadd.f32 %v391_v58, %v390_v56 }
  0xbb   : > { %v710_v62 = vpop.eup %709  ;;  %711 = vrsqrt.f32 %v392_v61  ;;  %vm400_vm2 = vcmp.eq.f32.partialorder %v392_v61, inf  ;;  %v403_v17 = vand.u32 2147483648, %v392_v61  ;;  %vm402_vm3 = vcmp.eq.f32.partialorder %v392_v61, 0.0 }
  0xbc   : > { %v378_v63 = vmul.f32 %v710_v62, %v376_v54 }
  0xbd   : > { %v359_v0 = vpop.f32.mrf.mxu2 }
  0xbe   : > { %v372_v1 = vpop.f32.mrf.mxu3  ;;  %v379_v2 = vmul.f32 %v710_v62, %v378_v63 }
  0xc0   : > { %v380_v3 = vmul.f32 0.5, %v379_v2 }
  0xc1   : > { %v712_v4 = vpop.eup %711 }
  0xc2   : > { %v381_v5 = vsub.f32 1.5, %v380_v3  ;;  %v394_v6 = vmul.f32 %v712_v4, %v392_v61 }
  0xc4   : > { %v382_v7 = vmul.f32 %v710_v62, %v381_v5  ;;  %v395_v8 = vmul.f32 %v712_v4, %v394_v6 }
  0xc6   : > { %v383_v9 = vmul.f32 %v382_v7, %v376_v54  ;;  %v396_v10 = vmul.f32 0.5, %v395_v8 }
  0xc8   : > { %v397_v11 = vsub.f32 1.5, %v396_v10  ;;  %v385_v12 = vsel %vm384_vm0, %v376_v54, %v383_v9 }
  0xc9   : > { %v388_v16 = vsel %vm386_vm1, %v387_v14, %v385_v12 }
  0xca   : > { %v398_v13 = vmul.f32 %v712_v4, %v397_v11  ;;  %v389_v20 = vadd.f32 1e-07, %v388_v16 }
  0xcc   : > { %v399_v15 = vmul.f32 %v398_v13, %v392_v61 }
  0xce   : > { %v401_v18 = vsel %vm400_vm2, %v392_v61, %v399_v15 }
  0xcf   : > { %v404_v19 = vsel %vm402_vm3, %v403_v17, %v401_v18 }
  0xd0   : > { %v405_v21 = vadd.f32 1e-07, %v404_v19 }
  0xd2   : > { %v406_v22 = vsub.f32 %v389_v20, %v405_v21  ;;  %713 = vrcp.f32 %v405_v21  ;;  %v407_v25 = vadd.f32 %v405_v21, %v389_v20 }
  0xd4   : > { %v410_v23 = vmul.f32 %v406_v22, %v406_v22  ;;  %v421_v27 = vmul.f32 %v407_v25, %v407_v25 }
  0xd6   : > { %411 = vadd.xlane.f32.xlu0 %v410_v23 }
  0xd8   : > { %v714_v24 = vpop.eup %713 }
  0xd9   : > { %v409_v26 = vmul.f32 %v714_v24, %v389_v20 }
  0xdb   : > { %715 = vlog2.f32 %v409_v26 }
  0xde   : > { %422 = vadd.xlane.f32.xlu0 %v421_v27 }
  0xe1   : > { %v716_v28 = vpop.eup %715 }
  0xe2   : > { %v433_v29 = vmul.f32 0.6931472, %v716_v28 }
  0xe4   : > { %v434_v30 = vand.u32 2147483647, %v433_v29 }
  0xe6   : > { %435 = vadd.xlane.f32.xlu1 %v434_v30 }
 0x149   : > { %v412_v31 = vpop.xlane.xlu0 %411 }
 0x14a   : > { %v413_v32 = vrot.slane %v412_v31, 4 }
 0x14c   : > { %v414_v33 = vadd.f32 %v413_v32, %v412_v31 }
 0x14e   : > { %v415_v34 = vrot.slane %v414_v33, 2 }
 0x150   : > { %v416_v35 = vadd.f32 %v415_v34, %v414_v33 }
 0x151   : > { %v423_v36 = vpop.xlane.xlu0 %422 }
 0x152   : > { %v424_v37 = vrot.slane %v423_v36, 4  ;;  %v417_v38 = vrot.slane %v416_v35, 1 }
 0x154   : > { %v425_v39 = vadd.f32 %v424_v37, %v423_v36  ;;  %v418_v40 = vadd.f32 %v417_v38, %v416_v35 }
 0x156   : > { %v426_v41 = vrot.slane %v425_v39, 2  ;;  %659 = vpush %v418_v40 }
 0x158   : > { %v427_v42 = vadd.f32 %v426_v41, %v425_v39 }
 0x159   : > { %v436_v43 = vpop.xlane.xlu1 %435 }
 0x15a   : > { %v437_v44 = vrot.slane %v436_v43, 4  ;;  %v428_v45 = vrot.slane %v427_v42, 1 }
 0x15c   : > { %v438_v46 = vadd.f32 %v437_v44, %v436_v43  ;;  %v429_v47 = vadd.f32 %v428_v45, %v427_v42 }
 0x15e   : > { %v439_v48 = vrot.slane %v438_v46, 2  ;;  %661 = vpush %v429_v47 }
 0x160   : > { %v440_v49 = vadd.f32 %v439_v48, %v438_v46 }
 0x162   : > { %v441_v50 = vrot.slane %v440_v49, 1 }
 0x164   : > { %v442_v51 = vadd.f32 %v441_v50, %v440_v49 }
 0x166   : > { %663 = vpush %v442_v51 }
 0x187   : > { %s660_s6 = spop %659 }
 0x188   : > { %463 = sst [smem:[%s462_s7]] %s660_s6 }
 0x18f   : > { %s662_s9 = spop %661 }
 0x190   : > { %467 = sst [smem:[%s515_s8]] %s662_s9 }
 0x197   : > { %s664_s19 = spop %663 }
 0x198   : > { %471 = sst [smem:[%s518_s18]] %s664_s19 }
 0x199   : > { %670 = dma.smem_to_vmem (%p679_p8), %s796_s20, 32, %s479_s17, [#allocation5]  }
 0x19a   : > { %778 = dma.done.wait (%p679_p8), [#allocation5], 32  }
 0x19b   : > { %780 = vsyncadd (%p679_p8), [#allocation5], 4294967264 }
 0x19c   : > { %487 = sfence }
 0x19d PF: > { %s15_s14 = sadd.s32 1, %s791_s14   ;;  %s870_s12 = smov %s787_s13 }
 0x19e   : > { %p12_p9 = scmp.ge.s32.totalorder %s15_s14, 4   ;;  %s871_s13 = smov %s873_s16 }
 0x1a0   :  { %14 = sbr.rel (!%p12_p9) target bundleno = 3 (0x3), region = 84 }
 0x1a5   :  { %493 = vsyncpa [#allocation4], 1 }
 0x1a6   :  { %495 = vsyncpa [#allocation4 + $0x1], 1 }
 0x1a7   :  { %496 = vsyncpa [#allocation5], 1 }
 0x1a8   :  { %498 = vsyncpa [#allocation5 + $0x1], 1 }

</bundles_post_ra>
